<compile_context>
chip_gen: v7x
topology: tpu7x:2x2x1
jax: 0.10.0
libtpu: 0.0.40
codegen_flags: <defaults>
</compile_context>

<pallas_src>
import functools

import jax
import jax.numpy as jnp
from jax.experimental import pallas as pl
from jax.experimental.pallas import tpu as pltpu


def _make_mlp_kernel(num_hidden_layers):
    """Kernel for `num_hidden_layers` folded (Linear+BN+ReLU) blocks + out Linear."""

    def kernel(*refs):
        ef_ref = refs[0]                       # [2*in_f, TE] bf16 (edges on lanes)
        o_ref = refs[-1]                       # [1, TE] f32
        w_refs = refs[1:-1]

        h = ef_ref[...]                        # stay bf16 -> MXU-native matmuls

        idx = 0
        for _ in range(num_hidden_layers):
            w, t = w_refs[idx], w_refs[idx + 1]          # w: bf16 [H,K], t: f32 [H,1]
            idx += 2
            z = jnp.dot(w[...], h, preferred_element_type=jnp.float32) + t[...]
            h = jnp.maximum(z, 0.0).astype(jnp.bfloat16)  # bf16 between layers

        # Output layer: 1 unit, no activation (add_activation=None).
        w_out, b_out = w_refs[idx], w_refs[idx + 1]
        o_ref[...] = (jnp.dot(w_out[...], h, preferred_element_type=jnp.float32)
                      + b_out[...])                       # [1, TE] f32

    return kernel


def _choose_tile_e(num_edges, requested):
    """Pick the edge tile: lane-dense multiple of 512, bounded padding waste for
    small E, and at least 2 grid steps (v7x megacore) when there is enough work.
    Upper-capped at 32768 (v7x VMEM guidance; footprint stays << 32 MiB)."""
    requested = max(512, min(int(requested), 32768))
    e_round = -(-num_edges // 512) * 512
    tile = min(requested, e_round)
    if e_round >= 1024 and -(-num_edges // tile) < 2:
        tile = -(-(e_round // 2) // 512) * 512
    return max(tile, 512)


@functools.partial(jax.jit, static_argnames=("tile_e", "edge_buffers"))
def filtering_model_forward(x, edge_index, params, *, tile_e=8192, edge_buffers=2):
    """FilteringModel.forward.

    x:          [N, in_features] float32 node features
    edge_index: [2, E] int32
    params:     (hidden_layers, (w_out, b_out)); each hidden layer is
                (w [f_in, f_out], b, gamma, beta, running_mean, running_var)
                with x @ w matching PyTorch's Linear (w == W_torch.T).
    returns:    [E, 1] float32
    """
    hidden_layers, (w_out, b_out) = params
    n_hidden = len(hidden_layers)
    in_f = x.shape[1]
    eps = 1e-5

    E = edge_index.shape[1]
    tile = _choose_tile_e(E, tile_e)
    n_tiles = pl.cdiv(E, tile)
    e_pad = n_tiles * tile
    row = jnp.pad(edge_index[0], (0, e_pad - E))
    col = jnp.pad(edge_index[1], (0, e_pad - E))

    # Edge features, feature-major (edges on lanes), bf16 on the HBM path.
    # One major-axis row gather (what XLA lowers well) + one narrow transpose;
    # the edge-major [E, 2*in_f] concat is never materialized in that layout.
    x_bf = x.astype(jnp.bfloat16)                                   # [N, in_f]
    gathered = jnp.take(x_bf, jnp.concatenate([row, col]), axis=0)  # [2*e_pad, in_f]
    ef_t = (gathered.reshape(2, e_pad, in_f)
            .transpose(0, 2, 1)
            .reshape(2 * in_f, e_pad))          # rows = [x[row] feats ; x[col] feats]

    # Fold eval-mode BatchNorm1d into each Linear: BN(x@w + b) = x@(w*s) + t,
    # s = gamma/sqrt(var+eps), t = beta + (b - mean)*s.  Weights -> bf16 (MXU
    # native on v5e/v6e/v7x); biases stay f32.
    operands = [ef_t]
    for (w, b, g, be, rm, rv) in hidden_layers:
        s = g * jax.lax.rsqrt(rv + eps)
        t = be + (b - rm) * s
        operands.append((w * s[None, :]).T.astype(jnp.bfloat16))    # [out, in] bf16
        operands.append(t.reshape(-1, 1))                           # [out, 1]  f32
    operands.append(w_out.T.astype(jnp.bfloat16))                   # [1, H_last] bf16
    operands.append(b_out.reshape(1, 1))                            # [1, 1]     f32

    edge_spec_kwargs = {}
    if edge_buffers != 2:
        # Deeper pipelining of the edge stream (perf-review knob; sweep to 3 if
        # the per-tile edge DMA is still exposed on real workloads).
        edge_spec_kwargs["pipeline_mode"] = pl.Buffered(edge_buffers)
    edge_spec = pl.BlockSpec((2 * in_f, tile), lambda i: (0, i), **edge_spec_kwargs)
    # Constant index maps keep the (tiny) weights/biases resident across the grid.
    in_specs = [edge_spec] + [
        pl.BlockSpec(op.shape, lambda i: (0, 0)) for op in operands[1:]
    ]

    out = pl.pallas_call(
        _make_mlp_kernel(n_hidden),
        out_shape=jax.ShapeDtypeStruct((1, e_pad), jnp.float32),
        grid_spec=pltpu.PrefetchScalarGridSpec(
            num_scalar_prefetch=0,
            grid=(n_tiles,),
            in_specs=in_specs,
            out_specs=pl.BlockSpec((1, tile), lambda i: (0, i)),
        ),
        compiler_params=pltpu.CompilerParams(
            dimension_semantics=("parallel",)),
    )(*operands)

    return out[0, :E].reshape(E, 1)


def _reference_forward(x, edge_index, params):
    """Pure-JAX reference with the kernel's quantization (bf16 inputs, bf16
    folded weights, bf16 inter-layer activations, f32 accumulation)."""
    hidden_layers, (w_out, b_out) = params
    eps = 1e-5
    hp = jax.lax.Precision.HIGHEST
    q = lambda a: a.astype(jnp.bfloat16).astype(jnp.float32)
    row, col = edge_index[0], edge_index[1]
    xq = q(x)
    h = jnp.concatenate((xq[row], xq[col]), axis=1)
    for (w, b, g, be, rm, rv) in hidden_layers:
        s = g * jax.lax.rsqrt(rv + eps)
        t = be + (b - rm) * s
        h = jnp.dot(h, q(w * s[None, :]), precision=hp) + t
        h = q(jnp.maximum(h, 0.0))
    return jnp.dot(h, q(w_out), precision=hp) + b_out


def _init_params(key, in_features, hidden_features):
    """Deterministic Linear + BatchNorm1d (affine + running stats) parameters."""
    sizes = [2 * in_features] + list(hidden_features)
    layers = []
    k = key
    for fin, fout in zip(sizes[:-1], sizes[1:]):
        k, k1, k2, k3, k4, k5, k6 = jax.random.split(k, 7)
        lim = 1.0 / jnp.sqrt(fin)
        w = jax.random.uniform(k1, (fin, fout), jnp.float32, -lim, lim)
        b = jax.random.uniform(k2, (fout,), jnp.float32, -lim, lim)
        g = 1.0 + 0.1 * jax.random.normal(k3, (fout,), jnp.float32)
        be = 0.1 * jax.random.normal(k4, (fout,), jnp.float32)
        rm = 0.1 * jax.random.normal(k5, (fout,), jnp.float32)
        rv = 1.0 + 0.1 * jax.random.uniform(k6, (fout,), jnp.float32)
        layers.append((w, b, g, be, rm, rv))
    k, k1, k2 = jax.random.split(k, 3)
    lim = 1.0 / jnp.sqrt(sizes[-1])
    w_out = jax.random.uniform(k1, (sizes[-1], 1), jnp.float32, -lim, lim)
    b_out = jax.random.uniform(k2, (1,), jnp.float32, -lim, lim)
    return (tuple(layers), (w_out, b_out))


if __name__ == "__main__":
    key = jax.random.PRNGKey(0)
    in_features = 4          # node feature dim -> edge feature dim = 8
    hidden_features = [32, 32]
    num_nodes = 64
    num_edges = 2000         # not a tile multiple -> exercises the clamp + padding

    k_x, k_e, k_p = jax.random.split(key, 3)
    x = jax.random.normal(k_x, (num_nodes, in_features), jnp.float32)
    edge_index = jax.random.randint(k_e, (2, num_edges), 0, num_nodes, jnp.int32)
    params = _init_params(k_p, in_features, hidden_features)

    out = filtering_model_forward(x, edge_index, params)
    out = jax.block_until_ready(out)

    ref = _reference_forward(x, edge_index, params)
    assert out.shape == (num_edges, 1), out.shape
    err = float(jnp.max(jnp.abs(out - ref)))
    assert err < 5e-3, f"Pallas output mismatch vs reference (max abs err {err})"

    print("KERNEL_OK")
</pallas_src>

<mosaic_0001>
module attributes {stable_mosaic.version = 11 : i64} {
  func.func @kernel(%arg0: i32, %arg1: memref<8x1024xbf16, #tpu.memory_space<vmem>>, %arg2: memref<32x8xbf16, #tpu.memory_space<vmem>>, %arg3: memref<32x1xf32, #tpu.memory_space<vmem>>, %arg4: memref<32x32xbf16, #tpu.memory_space<vmem>>, %arg5: memref<32x1xf32, #tpu.memory_space<vmem>>, %arg6: memref<1x32xbf16, #tpu.memory_space<vmem>>, %arg7: memref<1x1xf32, #tpu.memory_space<vmem>>, %arg8: memref<1x1024xf32, #tpu.memory_space<vmem>>) attributes {dimension_semantics = [#tpu.dimension_semantics<parallel>], iteration_bounds = array<i64: 2>, scalar_prefetch = 0 : i64, scratch_operands = 0 : i64, tpu.core_type = #tpu.core_type<tc>, window_params = [{transform_indices = @transform_0, window_bounds = array<i64: 8, 1024>}, {pipeline_mode = #tpu.pipeline_mode<synchronous>, transform_indices = @transform_1, window_bounds = array<i64: 32, 8>}, {pipeline_mode = #tpu.pipeline_mode<synchronous>, transform_indices = @transform_2, window_bounds = array<i64: 32, 1>}, {pipeline_mode = #tpu.pipeline_mode<synchronous>, transform_indices = @transform_3, window_bounds = array<i64: 32, 32>}, {pipeline_mode = #tpu.pipeline_mode<synchronous>, transform_indices = @transform_4, window_bounds = array<i64: 32, 1>}, {pipeline_mode = #tpu.pipeline_mode<synchronous>, transform_indices = @transform_5, window_bounds = array<i64: 1, 32>}, {pipeline_mode = #tpu.pipeline_mode<synchronous>, transform_indices = @transform_6, window_bounds = array<i64: 1, 1>}, {transform_indices = @transform_7, window_bounds = array<i64: 1, 1024>}]} {
    %c0 = arith.constant 0 : index
    %c0_0 = arith.constant 0 : index
    %0 = vector.load %arg1[%c0, %c0_0] : memref<8x1024xbf16, #tpu.memory_space<vmem>>, vector<8x1024xbf16>
    %c0_1 = arith.constant 0 : index
    %c0_2 = arith.constant 0 : index
    %1 = vector.load %arg2[%c0_1, %c0_2] : memref<32x8xbf16, #tpu.memory_space<vmem>>, vector<32x8xbf16>
    %cst = arith.constant dense<0.000000e+00> : vector<32x1024xf32>
    %2 = tpu.matmul %1, %0, %cst {dimension_numbers = #tpu.dot_dimension_numbers<[1], [0], [0], [1], [0, 0, 1, 1], [], []>} : vector<32x8xbf16>, vector<8x1024xbf16>, vector<32x1024xf32> -> vector<32x1024xf32>
    %c0_3 = arith.constant 0 : index
    %c0_4 = arith.constant 0 : index
    %3 = vector.load %arg3[%c0_3, %c0_4] : memref<32x1xf32, #tpu.memory_space<vmem>>, vector<32x1xf32>
    %4 = vector.broadcast %3 : vector<32x1xf32> to vector<32x1024xf32>
    %5 = arith.addf %2, %4 : vector<32x1024xf32>
    %cst_5 = arith.constant 0.000000e+00 : f32
    %6 = vector.broadcast %cst_5 : f32 to vector<32x1024xf32>
    %7 = arith.maximumf %5, %6 : vector<32x1024xf32>
    %8 = arith.truncf %7 : vector<32x1024xf32> to vector<32x1024xbf16>
    %c0_6 = arith.constant 0 : index
    %c0_7 = arith.constant 0 : index
    %9 = vector.load %arg4[%c0_6, %c0_7] : memref<32x32xbf16, #tpu.memory_space<vmem>>, vector<32x32xbf16>
    %cst_8 = arith.constant dense<0.000000e+00> : vector<32x1024xf32>
    %10 = tpu.matmul %9, %8, %cst_8 {dimension_numbers = #tpu.dot_dimension_numbers<[1], [0], [0], [1], [0, 0, 1, 1], [], []>} : vector<32x32xbf16>, vector<32x1024xbf16>, vector<32x1024xf32> -> vector<32x1024xf32>
    %c0_9 = arith.constant 0 : index
    %c0_10 = arith.constant 0 : index
    %11 = vector.load %arg5[%c0_9, %c0_10] : memref<32x1xf32, #tpu.memory_space<vmem>>, vector<32x1xf32>
    %12 = vector.broadcast %11 : vector<32x1xf32> to vector<32x1024xf32>
    %13 = arith.addf %10, %12 : vector<32x1024xf32>
    %cst_11 = arith.constant 0.000000e+00 : f32
    %14 = vector.broadcast %cst_11 : f32 to vector<32x1024xf32>
    %15 = arith.maximumf %13, %14 : vector<32x1024xf32>
    %16 = arith.truncf %15 : vector<32x1024xf32> to vector<32x1024xbf16>
    %c0_12 = arith.constant 0 : index
    %c0_13 = arith.constant 0 : index
    %17 = vector.load %arg6[%c0_12, %c0_13] : memref<1x32xbf16, #tpu.memory_space<vmem>>, vector<1x32xbf16>
    %cst_14 = arith.constant dense<0.000000e+00> : vector<1x1024xf32>
    %18 = tpu.matmul %17, %16, %cst_14 {dimension_numbers = #tpu.dot_dimension_numbers<[1], [0], [0], [1], [0, 0, 1, 1], [], []>} : vector<1x32xbf16>, vector<32x1024xbf16>, vector<1x1024xf32> -> vector<1x1024xf32>
    %c0_15 = arith.constant 0 : index
    %c0_16 = arith.constant 0 : index
    %19 = vector.load %arg7[%c0_15, %c0_16] : memref<1x1xf32, #tpu.memory_space<vmem>>, vector<1x1xf32>
    %20 = vector.broadcast %19 : vector<1x1xf32> to vector<1x1024xf32>
    %21 = arith.addf %18, %20 : vector<1x1024xf32>
    %c0_17 = arith.constant 0 : index
    %c0_18 = arith.constant 0 : index
    %22 = vector.load %arg8[%c0_17, %c0_18] : memref<1x1024xf32, #tpu.memory_space<vmem>>, vector<1x1024xf32>
    tpu.vector_store %arg8[%c0_17, %c0_18], %21 {strides = array<i32>} : memref<1x1024xf32, #tpu.memory_space<vmem>>, vector<1x1024xf32>,
    return
  }
  func.func @transform_0(%arg0: i32) -> (i32, i32) {
    %c0_i32 = arith.constant 0 : i32
    %c0_i32_0 = arith.constant 0 : i32
    return %c0_i32, %arg0 : i32, i32
  }
  func.func @transform_1(%arg0: i32) -> (i32, i32) {
    %c0_i32 = arith.constant 0 : i32
    %c0_i32_0 = arith.constant 0 : i32
    %c0_i32_1 = arith.constant 0 : i32
    return %c0_i32, %c0_i32_0 : i32, i32
  }
  func.func @transform_2(%arg0: i32) -> (i32, i32) {
    %c0_i32 = arith.constant 0 : i32
    %c0_i32_0 = arith.constant 0 : i32
    %c0_i32_1 = arith.constant 0 : i32
    return %c0_i32, %c0_i32_0 : i32, i32
  }
  func.func @transform_3(%arg0: i32) -> (i32, i32) {
    %c0_i32 = arith.constant 0 : i32
    %c0_i32_0 = arith.constant 0 : i32
    %c0_i32_1 = arith.constant 0 : i32
    return %c0_i32, %c0_i32_0 : i32, i32
  }
  func.func @transform_4(%arg0: i32) -> (i32, i32) {
    %c0_i32 = arith.constant 0 : i32
    %c0_i32_0 = arith.constant 0 : i32
    %c0_i32_1 = arith.constant 0 : i32
    return %c0_i32, %c0_i32_0 : i32, i32
  }
  func.func @transform_5(%arg0: i32) -> (i32, i32) {
    %c0_i32 = arith.constant 0 : i32
    %c0_i32_0 = arith.constant 0 : i32
    %c0_i32_1 = arith.constant 0 : i32
    return %c0_i32, %c0_i32_0 : i32, i32
  }
  func.func @transform_6(%arg0: i32) -> (i32, i32) {
    %c0_i32 = arith.constant 0 : i32
    %c0_i32_0 = arith.constant 0 : i32
    %c0_i32_1 = arith.constant 0 : i32
    return %c0_i32, %c0_i32_0 : i32, i32
  }
  func.func @transform_7(%arg0: i32) -> (i32, i32) {
    %c0_i32 = arith.constant 0 : i32
    %c0_i32_0 = arith.constant 0 : i32
    return %c0_i32, %arg0 : i32, i32
  }
}

</mosaic_0001>

<bundles_post_ra>
// kernel: filtering_model_forward.1
= control target key start
LH: loop header
LB: loop body
LE: loop exit
PB: predicated region body
PF: predicated region fallthrough
CT: control target
= control target key end

     0   :  { %s1352_s26 = smov 0   ;;  %s1548_s0 = inlined_call_operand.vmem [shape: bf16[8,2048], index: 0, kind: input, shape index: {}]   ;;  %s1549_s1 = inlined_call_operand.vmem [shape: bf16[32,8], index: 1, kind: input, shape index: {}]   ;;  %s1550_s2 = inlined_call_operand.vmem [shape: f32[32,1], index: 2, kind: input, shape index: {}]   ;;  %s1551_s3 = inlined_call_operand.vmem [shape: bf16[32,32], index: 3, kind: input, shape index: {}]   ;;  %s1552_s4 = inlined_call_operand.vmem [shape: f32[32,1], index: 4, kind: input, shape index: {}]   ;;  %s1553_s5 = inlined_call_operand.vmem [shape: bf16[1,32], index: 5, kind: input, shape index: {}]   ;;  %s1554_s6 = inlined_call_operand.<no memory space> [shape: f32[1,1], index: 6, kind: input, shape index: {}]   ;;  %s1555_s7 = inlined_call_operand.vmem [shape: f32[1,2048], index: 7, kind: output, shape index: {}]  }
   0x1   :  { %v12_v0 = vstv %s1554_s6 }
   0x2   :  { %13 = vst [vmem:[#allocation2] sm:$0x1] %v12_v0 }
   0x3 LB: > { %s1229_s27 = sadd.s32 4294967295, %s1305_s26   ;;  %p1233_p0 = scmp.ge.s32.totalorder %s1305_s26, 1  ;;  %s1305_s26 = sphi %s1352_s26, %s19_s26  }
   0x4   : > { %p240_p1 = scmp.lt.s32.totalorder %s1305_s26, 3 }
   0x6   : > { %p241_p2 = pnand %p1233_p0, %p240_p1 }
   0x7   : > { %s1234_s28 = sshll.u32 (!%p241_p2), %s1229_s27, 3  ;;  %v1307_v1 = vmov (!%p241_p2), 0   ;;  %v291_v2 = vld [vmem:[%s1550_s2] sm:$0xff] (!%p241_p2)  ;;  %v293_v3 = vld [vmem:[%s1550_s2 + $0x10] sm:$0xff] (!%p241_p2)  ;;  %v292_v4 = vld [vmem:[%s1550_s2 + $0x8] sm:$0xff] (!%p241_p2)  ;;  %vm352_vm0 = vcmask (!%p241_p2), 1043456  }
   0x8   : > { %244 = sbr.rel (%p241_p2) target bundleno = 733 (0x2dd), region = 48  ;;  %p272_p3 = scmp.lt.s32.totalorder (!%p241_p2), %s1234_s28, 15  ;;  %409 = vmatprep.mubr.bf16.mxu0 (!%p241_p2), %v1307_v1  ;;  %462 = vmatprep.mubr.bf16.mxu1 (!%p241_p2), %v1307_v1  ;;  %v294_v5 = vld [vmem:[%s1550_s2 + $0x18] sm:$0xff] (!%p241_p2)  ;;  %v1291_v20 = vld [vmem:[%s1549_s1] sm:$0xff] (!%p241_p2)   ;;  %v642_v22 = vld [vmem:[%s1552_s4 + $0x8] sm:$0xff] (!%p241_p2)  ;;  %vm345_vm1 = vcmask (!%p241_p2), 64512  }
   0x9   : > { %1285 = vset.pattern.permute.xlu0 (!%p241_p2), %v1307_v1  ;;  %1286 = vset.pattern.permute.xlu1 (!%p241_p2), %v1307_v1  ;;  %v641_v21 = vld [vmem:[%s1552_s4] sm:$0xff] (!%p241_p2)  ;;  %v643_v25 = vld [vmem:[%s1552_s4 + $0x10] sm:$0xff] (!%p241_p2)  ;;  %v644_v26 = vld [vmem:[%s1552_s4 + $0x18] sm:$0xff] (!%p241_p2)  ;;  %vm675_vm2 = vcmask (!%p241_p2), 261120  }
   0xa   : > { %297 = vperm.xlu0 (!%p241_p2), %1285, %v291_v2   ;;  %307 = vperm.xlu1 (!%p241_p2), %1286, %v293_v3   ;;  %v1296_v27 = vld [vmem:[%s1549_s1 + $0x8] sm:$0xff] (!%p241_p2)   ;;  %v943_v28 = vld [vmem:[#allocation2] sm:$0x1] (!%p241_p2) }
   0xe   : > { %302 = vperm.xlu0 (!%p241_p2), %1285, %v292_v4   ;;  %312 = vperm.xlu1 (!%p241_p2), %1286, %v294_v5  }
   0xf   : > { %s1557_s28 = smov (!%p272_p3, %s1234_s28), 15 }
  0x10   : > { %s1235_s11 = sshll.u32 %s1557_s28, 2  ;;  %s280_s15 = scalar_lea.vmem %s1555_s7, %s1557_s28 }
  0x11   : > { %s275_s16 = scalar_lea.vmem %s1548_s0, %s1235_s11 }
  0x12   : > { %v283_v6 = vld [vmem:[%s275_s16] sm:$0xff]  ;;  %v284_v7 = vld [vmem:[%s275_s16 + $0x8] sm:$0xff]  ;;  %v285_v8 = vld [vmem:[%s275_s16 + $0x10] sm:$0xff]  ;;  %647 = vperm.xlu0 %1285, %v641_v21   ;;  %652 = vperm.xlu1 %1286, %v642_v22  }
  0x13   : > { %v1240_v9 = vcombine.high %v283_v6, %v283_v6  ;;  %v1242_v10 = vcombine.high %v284_v7, %v284_v7  ;;  %v1239_v11 = vcombine.low %v283_v6, %v283_v6  ;;  %v1241_v12 = vcombine.low %v284_v7, %v284_v7  ;;  %v286_v13 = vld [vmem:[%s275_s16 + $0x18] sm:$0xff] }
  0x14   : > { %v1244_v14 = vcombine.high %v285_v8, %v285_v8  ;;  %v1246_v15 = vcombine.high %v286_v13, %v286_v13  ;;  %v1243_v16 = vcombine.low %v285_v8, %v285_v8  ;;  %v1245_v17 = vcombine.low %v286_v13, %v286_v13 }
  0x15   : > { %1247 = vmatprep.subr.msk.bf16.mxu0 %vm352_vm0, %v1240_v9  ;;  %1250 = vmatprep.subr.msk.bf16.mxu1 %vm352_vm0, %v1242_v10  ;;  %v354_v18 = vsel %vm352_vm0, %v1239_v11, 0  ;;  %v360_v19 = vsel %vm352_vm0, %v1241_v12, 0 }
  0x16   : > { %378 = vmatpush1.bf16.msra.mxu0 %v354_v18  ;;  %431 = vmatpush1.bf16.msra.mxu1 %v360_v19  ;;  %v366_v23 = vsel %vm352_vm0, %v1243_v16, 0  ;;  %v372_v24 = vsel %vm352_vm0, %v1245_v17, 0 }
  0x17   : > { %1253 = vmatprep.subr.msk.bf16.mxu0 %vm352_vm0, %v1244_v14  ;;  %1256 = vmatprep.subr.msk.bf16.mxu1 %vm352_vm0, %v1246_v15 }
  0x18   : > { %657 = vperm.xlu0 %1285, %v643_v25   ;;  %662 = vperm.xlu1 %1286, %v644_v26  }
  0x19   : > { %1248 = vmatmul.mubr.msk.bf16.vlgmr.msra.gmra.mrb[0].mxu0 %vm345_vm1, %v1291_v20  ;;  %1251 = vmatmul.mubr.msk.bf16.vlgmr.msra.gmra.mrb[0].mxu1 %vm345_vm1, %v1291_v20 }
  0x1a   : > { %484 = vmatpush1.bf16.msra.mxu0 %v366_v23  ;;  %537 = vmatpush1.bf16.msra.mxu1 %v372_v24 }
  0x1b   : > { %419 = vmatprep.mubr.bf16.mxu0 %v1307_v1  ;;  %472 = vmatprep.mubr.bf16.mxu1 %v1307_v1 }
  0x1c   : > { %946 = vperm.xlu0 %1285, %v943_v28  }
  0x21   : > { %1249 = vmatmul.mubr.msk.bf16.gmra.mrb[4].mxu0 %vm345_vm1, %v1296_v27  ;;  %1252 = vmatmul.mubr.msk.bf16.gmra.mrb[4].mxu1 %vm345_vm1, %v1296_v27 }
  0x22   : > { %515 = vmatprep.mubr.bf16.mxu0 %v1307_v1  ;;  %568 = vmatprep.mubr.bf16.mxu1 %v1307_v1 }
  0x29   : > { %1254 = vmatmul.mubr.msk.bf16.vlgmr.msra.gmra.mrb[8].mxu0 %vm345_vm1, %v1291_v20  ;;  %1257 = vmatmul.mubr.msk.bf16.vlgmr.msra.gmra.mrb[8].mxu1 %vm345_vm1, %v1291_v20 }
  0x2a   : > { %525 = vmatprep.mubr.bf16.mxu0 %v1307_v1  ;;  %578 = vmatprep.mubr.bf16.mxu1 %v1307_v1 }
  0x31   : > { %1255 = vmatmul.mubr.msk.bf16.gmra.mrb[12].mxu0 %vm345_vm1, %v1296_v27  ;;  %1258 = vmatmul.mubr.msk.bf16.gmra.mrb[12].mxu1 %vm345_vm1, %v1296_v27 }
  0x32   : > { %714 = vmatprep.mubr.bf16.mxu0 %v1307_v1  ;;  %767 = vmatprep.mubr.bf16.mxu1 %v1307_v1 }
  0x89   : > { %v1424_v29 = vpop.permute.xlu0 %297  ;;  %v1428_v31 = vpop.permute.xlu1 %307 }
  0x8d   : > { %v1426_v30 = vpop.permute.xlu0 %302  ;;  %v1438_v56 = vpop.permute.xlu1 %312 }
  0xec   : > { %v411_v32 = vpop.f32.mrb[0].mxu0  ;;  %v464_v33 = vpop.f32.mrb[0].mxu1 }
  0xed   : > { %v412_v34 = vadd.f32 %v411_v32, %v1424_v29  ;;  %v465_v35 = vadd.f32 %v464_v33, %v1424_v29  ;;  %v413_v36 = vpop.f32.mrb[1].mxu0  ;;  %v466_v37 = vpop.f32.mrb[1].mxu1 }
  0xee   : > { %v414_v38 = vadd.f32 %v413_v36, %v1424_v29  ;;  %v467_v39 = vadd.f32 %v466_v37, %v1424_v29  ;;  %v415_v40 = vpop.f32.mrb[2].mxu0  ;;  %v468_v41 = vpop.f32.mrb[2].mxu1 }
  0xef   : > { %v416_v42 = vadd.f32 %v415_v40, %v1426_v30  ;;  %v469_v43 = vadd.f32 %v468_v41, %v1426_v30  ;;  %v417_v44 = vpop.f32.mrb[3].mxu0  ;;  %v470_v45 = vpop.f32.mrb[3].mxu1  ;;  %v589_v48 = vmax.f32 %v412_v34, 0.0  ;;  %v591_v49 = vmax.f32 %v465_v35, 0.0 }
  0xf0   : > { %v418_v46 = vadd.f32 %v417_v44, %v1426_v30  ;;  %v471_v47 = vadd.f32 %v470_v45, %v1426_v30  ;;  %v590_v52 = vmax.f32 %v414_v38, 0.0  ;;  %v592_v53 = vmax.f32 %v467_v39, 0.0  ;;  %v1455_v39 = vld [vmem:[%s1551_s3] sm:$0xff]  }
  0xf1   : > { %v597_v50 = vmax.f32 %v416_v42, 0.0  ;;  %v599_v51 = vmax.f32 %v469_v43, 0.0 }
  0xf2   : > { %v598_v54 = vmax.f32 %v418_v46, 0.0  ;;  %v600_v55 = vmax.f32 %v471_v47, 0.0 }
  0xf3   : > { %v621_v57 = vpack.c.bf16 %v597_v50, %v589_v48  ;;  %v623_v58 = vpack.c.bf16 %v599_v51, %v591_v49 }
  0xf4   : > { %v622_v59 = vpack.c.bf16 %v598_v54, %v590_v52  ;;  %v624_v60 = vpack.c.bf16 %v600_v55, %v592_v53  ;;  %v421_v61 = vpop.f32.mrb[4].mxu0  ;;  %v474_v62 = vpop.f32.mrb[4].mxu1 }
  0xf5   : > { %v422_v63 = vadd.f32 %v421_v61, %v1428_v31  ;;  %v475_v0 = vadd.f32 %v474_v62, %v1428_v31  ;;  %v423_v2 = vpop.f32.mrb[5].mxu0  ;;  %v476_v3 = vpop.f32.mrb[5].mxu1 }
  0xf6   : > { %v424_v4 = vadd.f32 %v423_v2, %v1428_v31  ;;  %v477_v5 = vadd.f32 %v476_v3, %v1428_v31  ;;  %v425_v6 = vpop.f32.mrb[6].mxu0  ;;  %v478_v7 = vpop.f32.mrb[6].mxu1  ;;  %682 = vmatprep.subr.bf16.mxu0 %v622_v59  ;;  %735 = vmatprep.subr.bf16.mxu1 %v624_v60 }
  0xf7   : > { %v426_v8 = vadd.f32 %v425_v6, %v1438_v56  ;;  %v479_v9 = vadd.f32 %v478_v7, %v1438_v56  ;;  %v427_v10 = vpop.f32.mrb[7].mxu0  ;;  %v480_v11 = vpop.f32.mrb[7].mxu1  ;;  %683 = vmatpush1.bf16.msra.mxu0 %v621_v57  ;;  %736 = vmatpush1.bf16.msra.mxu1 %v623_v58  ;;  %v605_v14 = vmax.f32 %v422_v63, 0.0  ;;  %v607_v15 = vmax.f32 %v475_v0, 0.0 }
  0xf8   : > { %v428_v12 = vadd.f32 %v427_v10, %v1438_v56  ;;  %v481_v13 = vadd.f32 %v480_v11, %v1438_v56  ;;  %v606_v18 = vmax.f32 %v424_v4, 0.0  ;;  %v608_v19 = vmax.f32 %v477_v5, 0.0  ;;  %v1298_v4 = vld [vmem:[%s1551_s3 + $0x8] sm:$0xff]  }
  0xf9   : > { %v613_v16 = vmax.f32 %v426_v8, 0.0  ;;  %v615_v17 = vmax.f32 %v479_v9, 0.0 }
  0xfa   : > { %v614_v20 = vmax.f32 %v428_v12, 0.0  ;;  %v616_v21 = vmax.f32 %v481_v13, 0.0 }
  0xfb   : > { %v629_v22 = vpack.c.bf16 %v613_v16, %v605_v14  ;;  %v631_v23 = vpack.c.bf16 %v615_v17, %v607_v15 }
  0xfc   : > { %v630_v24 = vpack.c.bf16 %v614_v20, %v606_v18  ;;  %v632_v25 = vpack.c.bf16 %v616_v21, %v608_v19  ;;  %v517_v26 = vpop.f32.mrb[8].mxu0  ;;  %v570_v27 = vpop.f32.mrb[8].mxu1 }
  0xfd   : > { %v518_v28 = vadd.f32 %v517_v26, %v1424_v29  ;;  %v571_v32 = vadd.f32 %v570_v27, %v1424_v29  ;;  %v519_v33 = vpop.f32.mrb[9].mxu0  ;;  %v572_v34 = vpop.f32.mrb[9].mxu1 }
  0xfe   : > { %v520_v35 = vadd.f32 %v519_v33, %v1424_v29  ;;  %v573_v36 = vadd.f32 %v572_v34, %v1424_v29  ;;  %v521_v37 = vpop.f32.mrb[10].mxu0  ;;  %v574_v38 = vpop.f32.mrb[10].mxu1  ;;  %684 = vmatprep.subr.bf16.mxu0 %v630_v24  ;;  %737 = vmatprep.subr.bf16.mxu1 %v632_v25 }
  0xff   : > { %v522_v40 = vadd.f32 %v521_v37, %v1426_v30  ;;  %v575_v41 = vadd.f32 %v574_v38, %v1426_v30  ;;  %v523_v42 = vpop.f32.mrb[11].mxu0  ;;  %v576_v43 = vpop.f32.mrb[11].mxu1  ;;  %685 = vmatpush1.bf16.msra.mxu0 %v629_v22  ;;  %738 = vmatpush1.bf16.msra.mxu1 %v631_v23  ;;  %v593_v45 = vmax.f32 %v518_v28, 0.0  ;;  %v595_v46 = vmax.f32 %v571_v32, 0.0 }
 0x100   : > { %v524_v29 = vadd.f32 %v523_v42, %v1426_v30  ;;  %v577_v44 = vadd.f32 %v576_v43, %v1426_v30  ;;  %v594_v49 = vmax.f32 %v520_v35, 0.0  ;;  %v596_v50 = vmax.f32 %v573_v36, 0.0  ;;  %v1492_v21 = vpop.permute.xlu0 %647  ;;  %v1494_v22 = vpop.permute.xlu1 %652 }
 0x101   : > { %v601_v47 = vmax.f32 %v522_v40, 0.0  ;;  %v603_v48 = vmax.f32 %v575_v41, 0.0 }
 0x102   : > { %v602_v51 = vmax.f32 %v524_v29, 0.0  ;;  %v604_v52 = vmax.f32 %v577_v44, 0.0  ;;  %1261 = vmatmul.mubr.msk.bf16.vlgmr.msra.gmra.mrb[16].mxu0 %vm675_vm2, %v1455_v39  ;;  %1263 = vmatmul.mubr.msk.bf16.vlgmr.msra.gmra.mrb[16].mxu1 %vm675_vm2, %v1455_v39 }
 0x103   : > { %v625_v53 = vpack.c.bf16 %v601_v47, %v593_v45  ;;  %v627_v54 = vpack.c.bf16 %v603_v48, %v595_v46  ;;  %724 = vmatprep.mubr.bf16.mxu0 %v1307_v1  ;;  %777 = vmatprep.mubr.bf16.mxu1 %v1307_v1 }
 0x104   : > { %v626_v30 = vpack.c.bf16 %v602_v51, %v594_v49  ;;  %v628_v55 = vpack.c.bf16 %v604_v52, %v596_v50  ;;  %v527_v57 = vpop.f32.mrb[12].mxu0  ;;  %v580_v58 = vpop.f32.mrb[12].mxu1 }
 0x105   : > { %v528_v59 = vadd.f32 %v527_v57, %v1428_v31  ;;  %v581_v60 = vadd.f32 %v580_v58, %v1428_v31  ;;  %v529_v61 = vpop.f32.mrb[13].mxu0  ;;  %v582_v62 = vpop.f32.mrb[13].mxu1 }
 0x106   : > { %v530_v63 = vadd.f32 %v529_v61, %v1428_v31  ;;  %v583_v0 = vadd.f32 %v582_v62, %v1428_v31  ;;  %v531_v2 = vpop.f32.mrb[14].mxu0  ;;  %v584_v3 = vpop.f32.mrb[14].mxu1  ;;  %788 = vmatprep.subr.bf16.mxu0 %v626_v30  ;;  %841 = vmatprep.subr.bf16.mxu1 %v628_v55 }
 0x107   : > { %v532_v5 = vadd.f32 %v531_v2, %v1438_v56  ;;  %v585_v6 = vadd.f32 %v584_v3, %v1438_v56  ;;  %v533_v7 = vpop.f32.mrb[15].mxu0  ;;  %v586_v8 = vpop.f32.mrb[15].mxu1  ;;  %789 = vmatpush1.bf16.msra.mxu0 %v625_v53  ;;  %842 = vmatpush1.bf16.msra.mxu1 %v627_v54  ;;  %v609_v10 = vmax.f32 %v528_v59, 0.0  ;;  %v611_v11 = vmax.f32 %v581_v60, 0.0 }
 0x108   : > { %v534_v9 = vadd.f32 %v533_v7, %v1438_v56  ;;  %v587_v31 = vadd.f32 %v586_v8, %v1438_v56  ;;  %v610_v14 = vmax.f32 %v530_v63, 0.0  ;;  %v612_v15 = vmax.f32 %v583_v0, 0.0  ;;  %v1504_v49 = vpop.permute.xlu0 %657  ;;  %v1506_v50 = vpop.permute.xlu1 %662 }
 0x109   : > { %v617_v12 = vmax.f32 %v532_v5, 0.0  ;;  %v619_v13 = vmax.f32 %v585_v6, 0.0 }
 0x10a   : > { %v618_v16 = vmax.f32 %v534_v9, 0.0  ;;  %v620_v17 = vmax.f32 %v587_v31, 0.0  ;;  %1262 = vmatmul.mubr.msk.bf16.gmra.mrb[20].mxu0 %vm675_vm2, %v1298_v4  ;;  %1264 = vmatmul.mubr.msk.bf16.gmra.mrb[20].mxu1 %vm675_vm2, %v1298_v4 }
 0x10b   : > { %v633_v18 = vpack.c.bf16 %v617_v12, %v609_v10  ;;  %v635_v19 = vpack.c.bf16 %v619_v13, %v611_v11  ;;  %820 = vmatprep.mubr.bf16.mxu0 %v1307_v1  ;;  %873 = vmatprep.mubr.bf16.mxu1 %v1307_v1 }
 0x10c   : > { %v634_v20 = vpack.c.bf16 %v618_v16, %v610_v14  ;;  %v636_v56 = vpack.c.bf16 %v620_v17, %v612_v15 }
 0x10e   : > { %790 = vmatprep.subr.bf16.mxu0 %v634_v20  ;;  %843 = vmatprep.subr.bf16.mxu1 %v636_v56 }
 0x10f   : > { %791 = vmatpush1.bf16.msra.mxu0 %v633_v18  ;;  %844 = vmatpush1.bf16.msra.mxu1 %v635_v19 }
 0x112   : > { %1265 = vmatmul.mubr.msk.bf16.vlgmr.msra.gmra.mrb[24].mxu0 %vm675_vm2, %v1455_v39  ;;  %1267 = vmatmul.mubr.msk.bf16.vlgmr.msra.gmra.mrb[24].mxu1 %vm675_vm2, %v1455_v39 }
 0x113   : > { %830 = vmatprep.mubr.bf16.mxu0 %v1307_v1  ;;  %883 = vmatprep.mubr.bf16.mxu1 %v1307_v1 }
 0x11a   : > { %1266 = vmatmul.mubr.msk.bf16.gmra.mrb[28].mxu0 %vm675_vm2, %v1298_v4  ;;  %1268 = vmatmul.mubr.msk.bf16.gmra.mrb[28].mxu1 %vm675_vm2, %v1298_v4 }
 0x11b   : > { %988 = vmatprep.mubr.bf16.mxu0 %v1307_v1  ;;  %1029 = vmatprep.mubr.bf16.mxu1 %v1307_v1 }
 0x1d5   : > { %v716_v23 = vpop.f32.mrb[16].mxu0  ;;  %v769_v24 = vpop.f32.mrb[16].mxu1 }
 0x1d6   : > { %v717_v25 = vadd.f32 %v716_v23, %v1492_v21  ;;  %v770_v26 = vadd.f32 %v769_v24, %v1492_v21  ;;  %v718_v27 = vpop.f32.mrb[17].mxu0  ;;  %v771_v28 = vpop.f32.mrb[17].mxu1 }
 0x1d7   : > { %v719_v32 = vadd.f32 %v718_v27, %v1492_v21  ;;  %v772_v33 = vadd.f32 %v771_v28, %v1492_v21  ;;  %v720_v34 = vpop.f32.mrb[18].mxu0  ;;  %v773_v35 = vpop.f32.mrb[18].mxu1 }
 0x1d8   : > { %v721_v36 = vadd.f32 %v720_v34, %v1494_v22  ;;  %v774_v37 = vadd.f32 %v773_v35, %v1494_v22  ;;  %v722_v38 = vpop.f32.mrb[19].mxu0  ;;  %v775_v39 = vpop.f32.mrb[19].mxu1  ;;  %v894_v42 = vmax.f32 %v717_v25, 0.0  ;;  %v896_v43 = vmax.f32 %v770_v26, 0.0 }
 0x1d9   : > { %v723_v40 = vadd.f32 %v722_v38, %v1494_v22  ;;  %v776_v41 = vadd.f32 %v775_v39, %v1494_v22  ;;  %v895_v45 = vmax.f32 %v719_v32, 0.0  ;;  %v897_v46 = vmax.f32 %v772_v33, 0.0 }
 0x1da   : > { %v902_v29 = vmax.f32 %v721_v36, 0.0  ;;  %v904_v44 = vmax.f32 %v774_v37, 0.0  ;;  %v942_v37 = vld [vmem:[%s1553_s5] sm:$0x1] }
 0x1db   : > { %v903_v47 = vmax.f32 %v723_v40, 0.0  ;;  %v905_v48 = vmax.f32 %v776_v41, 0.0 }
 0x1dc   : > { %v926_v51 = vpack.c.bf16 %v902_v29, %v894_v42  ;;  %v928_v52 = vpack.c.bf16 %v904_v44, %v896_v43 }
 0x1dd   : > { %v927_v53 = vpack.c.bf16 %v903_v47, %v895_v45  ;;  %v929_v54 = vpack.c.bf16 %v905_v48, %v897_v46  ;;  %v726_v30 = vpop.f32.mrb[20].mxu0  ;;  %v779_v55 = vpop.f32.mrb[20].mxu1 }
 0x1de   : > { %v727_v57 = vadd.f32 %v726_v30, %v1504_v49  ;;  %v780_v58 = vadd.f32 %v779_v55, %v1504_v49  ;;  %v728_v59 = vpop.f32.mrb[21].mxu0  ;;  %v781_v60 = vpop.f32.mrb[21].mxu1 }
 0x1df   : > { %v729_v61 = vadd.f32 %v728_v59, %v1504_v49  ;;  %v782_v62 = vadd.f32 %v781_v60, %v1504_v49  ;;  %v730_v63 = vpop.f32.mrb[22].mxu0  ;;  %v783_v0 = vpop.f32.mrb[22].mxu1  ;;  %956 = vmatprep.subr.bf16.mxu0 %v927_v53  ;;  %997 = vmatprep.subr.bf16.mxu1 %v929_v54 }
 0x1e0   : > { %v731_v2 = vadd.f32 %v730_v63, %v1506_v50  ;;  %v784_v3 = vadd.f32 %v783_v0, %v1506_v50  ;;  %v732_v4 = vpop.f32.mrb[23].mxu0  ;;  %v785_v5 = vpop.f32.mrb[23].mxu1  ;;  %957 = vmatpush1.bf16.msra.mxu0 %v926_v51  ;;  %998 = vmatpush1.bf16.msra.mxu1 %v928_v52  ;;  %v910_v8 = vmax.f32 %v727_v57, 0.0  ;;  %v912_v9 = vmax.f32 %v780_v58, 0.0 }
 0x1e1   : > { %v733_v6 = vadd.f32 %v732_v4, %v1506_v50  ;;  %v786_v7 = vadd.f32 %v785_v5, %v1506_v50  ;;  %v911_v11 = vmax.f32 %v729_v61, 0.0  ;;  %v913_v12 = vmax.f32 %v782_v62, 0.0 }
 0x1e2   : > { %v918_v31 = vmax.f32 %v731_v2, 0.0  ;;  %v920_v10 = vmax.f32 %v784_v3, 0.0 }
 0x1e3   : > { %v919_v13 = vmax.f32 %v733_v6, 0.0  ;;  %v921_v14 = vmax.f32 %v786_v7, 0.0 }
 0x1e4   : > { %v934_v15 = vpack.c.bf16 %v918_v31, %v910_v8  ;;  %v936_v16 = vpack.c.bf16 %v920_v10, %v912_v9 }
 0x1e5   : > { %v935_v17 = vpack.c.bf16 %v919_v13, %v911_v11  ;;  %v937_v18 = vpack.c.bf16 %v921_v14, %v913_v12  ;;  %v822_v19 = vpop.f32.mrb[24].mxu0  ;;  %v875_v20 = vpop.f32.mrb[24].mxu1  ;;  %v1308_v14 = vmov 1966171168  }
 0x1e6   : > { %v823_v56 = vadd.f32 %v822_v19, %v1492_v21  ;;  %v876_v23 = vadd.f32 %v875_v20, %v1492_v21  ;;  %v824_v24 = vpop.f32.mrb[25].mxu0  ;;  %v877_v25 = vpop.f32.mrb[25].mxu1 }
 0x1e7   : > { %v825_v26 = vadd.f32 %v824_v24, %v1492_v21  ;;  %v878_v27 = vadd.f32 %v877_v25, %v1492_v21  ;;  %v826_v28 = vpop.f32.mrb[26].mxu0  ;;  %v879_v32 = vpop.f32.mrb[26].mxu1  ;;  %958 = vmatprep.subr.bf16.mxu0 %v935_v17  ;;  %999 = vmatprep.subr.bf16.mxu1 %v937_v18 }
 0x1e8   : > { %v827_v33 = vadd.f32 %v826_v28, %v1494_v22  ;;  %v880_v34 = vadd.f32 %v879_v32, %v1494_v22  ;;  %v828_v35 = vpop.f32.mrb[27].mxu0  ;;  %v881_v36 = vpop.f32.mrb[27].mxu1  ;;  %959 = vmatpush1.bf16.msra.mxu0 %v934_v15  ;;  %1000 = vmatpush1.bf16.msra.mxu1 %v936_v16  ;;  %v898_v39 = vmax.f32 %v823_v56, 0.0  ;;  %v900_v40 = vmax.f32 %v876_v23, 0.0 }
 0x1e9   : > { %v829_v38 = vadd.f32 %v828_v35, %v1494_v22  ;;  %v882_v21 = vadd.f32 %v881_v36, %v1494_v22  ;;  %v899_v43 = vmax.f32 %v825_v26, 0.0  ;;  %v901_v29 = vmax.f32 %v878_v27, 0.0  ;;  %v947_v17 = vpop.permute.xlu0 %946 }
 0x1ea   : > { %v906_v41 = vmax.f32 %v827_v33, 0.0  ;;  %v908_v42 = vmax.f32 %v880_v34, 0.0  ;;  %v1133_v15 = vunpack.c.l.s4 %v1308_v14 }
 0x1eb   : > { %v907_v44 = vmax.f32 %v829_v38, 0.0  ;;  %v909_v45 = vmax.f32 %v882_v21, 0.0  ;;  %1269 = vmatmul.mubr.msk.bf16.vlgmr.msra.gmra.mrb[32].mxu0 %vm675_vm2, %v942_v37  ;;  %1270 = vmatmul.mubr.msk.bf16.vlgmr.msra.gmra.mrb[32].mxu1 %vm675_vm2, %v942_v37 }
 0x1ec   : > { %v930_v46 = vpack.c.bf16 %v906_v41, %v898_v39  ;;  %v932_v47 = vpack.c.bf16 %v908_v42, %v900_v40  ;;  %1070 = vmatprep.mubr.bf16.mxu0 %v1307_v1  ;;  %1111 = vmatprep.mubr.bf16.mxu1 %v1307_v1  ;;  %v1134_v18 = vunpack.c.0.s8 %v1133_v15 }
 0x1ed   : > { %v931_v48 = vpack.c.bf16 %v907_v44, %v899_v43  ;;  %v933_v22 = vpack.c.bf16 %v909_v45, %v901_v29  ;;  %v832_v51 = vpop.f32.mrb[28].mxu0  ;;  %v885_v52 = vpop.f32.mrb[28].mxu1 }
 0x1ee   : > { %v833_v53 = vadd.f32 %v832_v51, %v1504_v49  ;;  %v886_v54 = vadd.f32 %v885_v52, %v1504_v49  ;;  %v834_v30 = vpop.f32.mrb[29].mxu0  ;;  %v887_v55 = vpop.f32.mrb[29].mxu1 }
 0x1ef   : > { %v835_v57 = vadd.f32 %v834_v30, %v1504_v49  ;;  %v888_v58 = vadd.f32 %v887_v55, %v1504_v49  ;;  %v836_v59 = vpop.f32.mrb[30].mxu0  ;;  %v889_v60 = vpop.f32.mrb[30].mxu1  ;;  %1038 = vmatprep.subr.bf16.mxu0 %v931_v48  ;;  %1079 = vmatprep.subr.bf16.mxu1 %v933_v22 }
 0x1f0   : > { %v837_v1 = vadd.f32 %v836_v59, %v1506_v50  ;;  %v890_v61 = vadd.f32 %v889_v60, %v1506_v50  ;;  %v838_v62 = vpop.f32.mrb[31].mxu0  ;;  %v891_v63 = vpop.f32.mrb[31].mxu1  ;;  %1039 = vmatpush1.bf16.msra.mxu0 %v930_v46  ;;  %1080 = vmatpush1.bf16.msra.mxu1 %v932_v47  ;;  %v914_v3 = vmax.f32 %v833_v53, 0.0  ;;  %v916_v4 = vmax.f32 %v886_v54, 0.0 }
 0x1f1   : > { %v839_v0 = vadd.f32 %v838_v62, %v1506_v50  ;;  %v892_v2 = vadd.f32 %v891_v63, %v1506_v50  ;;  %v915_v6 = vmax.f32 %v835_v57, 0.0  ;;  %v917_v7 = vmax.f32 %v888_v58, 0.0 }
 0x1f2   : > { %v922_v5 = vmax.f32 %v837_v1, 0.0  ;;  %v924_v49 = vmax.f32 %v890_v61, 0.0  ;;  %v949_v50 = vlaneseq }
 0x1f3   : > { %v923_v8 = vmax.f32 %v839_v0, 0.0  ;;  %v925_v9 = vmax.f32 %v892_v2, 0.0 }
 0x1f4   : > { %v938_v31 = vpack.c.bf16 %v922_v5, %v914_v3  ;;  %v940_v10 = vpack.c.bf16 %v924_v49, %v916_v4  ;;  %v950_v13 = vshrl.u32 %v949_v50, 7 }
 0x1f5   : > { %v939_v11 = vpack.c.bf16 %v923_v8, %v915_v6  ;;  %v941_v12 = vpack.c.bf16 %v925_v9, %v917_v7 }
 0x1f6   : > { %v951_v16 = vsub.s32 0, %v950_v13  ;;  %v1137_v27 = vsub.s32 %v1134_v18, %v950_v13 }
 0x1f7   : > { %1040 = vmatprep.subr.bf16.mxu0 %v939_v11  ;;  %1081 = vmatprep.subr.bf16.mxu1 %v941_v12 }
 0x1f8   : > { %1041 = vmatpush1.bf16.msra.mxu0 %v938_v31  ;;  %1082 = vmatpush1.bf16.msra.mxu1 %v940_v10  ;;  %v952_v19 = vrot.slane %v947_v17, %v951_v16 }
 0x1fb   : > { %1271 = vmatmul.mubr.msk.bf16.vlgmr.msra.gmra.mrb[36].mxu0 %vm675_vm2, %v942_v37  ;;  %1272 = vmatmul.mubr.msk.bf16.vlgmr.msra.gmra.mrb[36].mxu1 %vm675_vm2, %v942_v37 }
 0x2be   : > { %v990_v20 = vpop.f32.mrb[32].mxu0  ;;  %v1031_v56 = vpop.f32.mrb[32].mxu1 }
 0x2bf   : > { %v991_v23 = vadd.f32 %v990_v20, %v952_v19  ;;  %v1032_v24 = vadd.f32 %v1031_v56, %v952_v19  ;;  %v992_v25 = vpop.f32.mrb[33].mxu0  ;;  %v1033_v26 = vpop.f32.mrb[33].mxu1 }
 0x2c0   : > { %v993_v28 = vadd.f32 %v992_v25, %v952_v19  ;;  %v1034_v32 = vadd.f32 %v1033_v26, %v952_v19  ;;  %v994_v33 = vpop.f32.mrb[34].mxu0  ;;  %v1035_v34 = vpop.f32.mrb[34].mxu1 }
 0x2c1   : > { %v995_v35 = vpop.f32.mrb[35].mxu0  ;;  %v1036_v36 = vpop.f32.mrb[35].mxu1 }
 0x2c2   : > { %v1128_v37 = vcombine.low %v991_v23, %v993_v28  ;;  %v1129_v38 = vcombine.low %v1032_v24, %v1034_v32 }
 0x2c4   : > { %v1138_v21 = vrot.slane %v1128_v37, %v1137_v27  ;;  %v1145_v39 = vrot.slane %v1129_v38, %v1137_v27 }
 0x2c6   : > { %v1160_v40 = vcombine.low %v1138_v21, %v1145_v39 }
 0x2c8   : > { %v1168_v58 = vrot.slane %v1160_v40, %v1137_v27 }
 0x2ce   : > { %v1072_v41 = vpop.f32.mrb[36].mxu0  ;;  %v1113_v42 = vpop.f32.mrb[36].mxu1 }
 0x2cf   : > { %v1073_v43 = vadd.f32 %v1072_v41, %v952_v19  ;;  %v1114_v29 = vadd.f32 %v1113_v42, %v952_v19  ;;  %v1074_v44 = vpop.f32.mrb[37].mxu0  ;;  %v1115_v45 = vpop.f32.mrb[37].mxu1 }
 0x2d0   : > { %v1075_v46 = vadd.f32 %v1074_v44, %v952_v19  ;;  %v1116_v47 = vadd.f32 %v1115_v45, %v952_v19  ;;  %v1076_v48 = vpop.f32.mrb[38].mxu0  ;;  %v1117_v22 = vpop.f32.mrb[38].mxu1 }
 0x2d1   : > { %v1077_v51 = vpop.f32.mrb[39].mxu0  ;;  %v1118_v52 = vpop.f32.mrb[39].mxu1 }
 0x2d2   : > { %v1130_v53 = vcombine.low %v1073_v43, %v1075_v46  ;;  %v1131_v54 = vcombine.low %v1114_v29, %v1116_v47 }
 0x2d4   : > { %v1152_v30 = vrot.slane %v1130_v53, %v1137_v27  ;;  %v1159_v55 = vrot.slane %v1131_v54, %v1137_v27 }
 0x2d6   : > { %v1161_v57 = vcombine.low %v1152_v30, %v1159_v55 }
 0x2d8   : > { %v1175_v59 = vrot.slane %v1161_v57, %v1137_v27 }
 0x2da   : > { %v1176_v60 = vcombine.low %v1168_v58, %v1175_v59 }
 0x2dc   : > { %1178 = vst [vmem:[%s280_s15] sm:$0xff] %v1176_v60 }
 0x2dd PF: > { %s19_s26 = sadd.s32 1, %s1305_s26  }
 0x2de   : > { %p16_p4 = scmp.ge.s32.totalorder %s19_s26, 4  }
 0x2e0   :  { %18 = sbr.rel (!%p16_p4) target bundleno = 3 (0x3), region = 78 }

</bundles_post_ra>
